<compile_context>
chip_gen: v7x
topology: tpu7x:2x2x1
jax: 0.10.0
libtpu: 0.0.40
codegen_flags: <defaults>
</compile_context>

<pallas_src>
import jax
import jax.numpy as jnp
from jax.experimental import pallas as pl
from jax.experimental.pallas import tpu as pltpu


def _round_up(n, m):
    return ((n + m - 1) // m) * m


def _strength_kernel(x_ref, y_ref, wx_ref, wy_ref, b_ref, o_ref):
    # x_ref, y_ref: [tm, H]; wx_ref, wy_ref: [H, 1]; b_ref: SMEM [1]; o_ref: [tm, 1]
    # Weights/bias are pre-combined and pre-scaled by 1/alpha on the host.
    logit = (
        jnp.dot(x_ref[...], wx_ref[...], preferred_element_type=jnp.float32)
        + jnp.dot(y_ref[...], wy_ref[...], preferred_element_type=jnp.float32)
        + b_ref[0]
    )  # [tm, 1] f32
    # 1 - sigmoid(d) == 1 / (1 + exp(d));  eval-mode dropout is identity.
    o_ref[...] = (1.0 / (1.0 + jnp.exp(logit))).astype(o_ref.dtype)


def strength_dial(x, y, weight, bias, *, alpha, use_softmax=True, tm=None):
    """Pallas implementation of StrengthDial.forward (eval mode).

    x, y:    [B, S, H]
    weight:  [C, 2H]   (C = 2 if use_softmax else 1)  -- nn.Linear weight
    bias:    [C]
    returns: [B, S, 1] float32
    """
    B, S, H = x.shape
    M = B * S
    in_dtype = x.dtype

    # ---- host-side weight prep (tiny, constant-sized arrays) ----
    w = weight.astype(jnp.float32)
    b = bias.astype(jnp.float32)
    inv_alpha = 1.0 / float(alpha)
    if use_softmax:
        # softmax over 2 classes -> sigmoid of logit difference
        w_eff = (w[0] - w[1]) * inv_alpha          # [2H]
        b_eff = (b[0] - b[1]) * inv_alpha          # scalar
    else:
        w_eff = w[0] * inv_alpha                   # [2H]
        b_eff = b[0] * inv_alpha                   # scalar
    # split concat-linear: concat(x, y) @ w_eff == x @ wx + y @ wy
    wx = w_eff[:H].reshape(H, 1).astype(in_dtype)
    wy = w_eff[H:].reshape(H, 1).astype(in_dtype)
    b_arr = jnp.reshape(b_eff, (1,))               # f32 scalar, lives in SMEM

    # No dtype upcast of the activations: feed them to the MXU as-is and
    # accumulate in f32 via preferred_element_type.
    x2 = x.reshape(M, H)
    y2 = y.reshape(M, H)

    # ---- row-tile choice: biggest tile that keeps the double-buffered input
    # footprint (2 inputs x 2 buffers x tm x H x itemsize) under ~16 MiB, so
    # it fits the default scoped-VMEM limit on v5e/v6e/v7x alike. ----
    if tm is None:
        itemsize = jnp.dtype(in_dtype).itemsize
        budget = 16 * 1024 * 1024
        tm = max(8, min(512, budget // max(4 * H * itemsize, 1)))
        tm = max(8, (tm // 8) * 8)
    tm = min(tm, _round_up(M, 8))

    # pad the ragged tail (if any) so padded rows never land in valid output
    M_pad = _round_up(M, tm)
    if M_pad != M:
        pad = M_pad - M
        x2 = jnp.pad(x2, ((0, pad), (0, 0)))
        y2 = jnp.pad(y2, ((0, pad), (0, 0)))

    grid = (M_pad // tm,)
    out = pl.pallas_call(
        _strength_kernel,
        out_shape=jax.ShapeDtypeStruct((M_pad, 1), jnp.float32),
        grid_spec=pltpu.PrefetchScalarGridSpec(
            num_scalar_prefetch=0,
            grid=grid,
            in_specs=[
                pl.BlockSpec((tm, H), lambda i: (i, 0)),   # x rows (streamed)
                pl.BlockSpec((tm, H), lambda i: (i, 0)),   # y rows (streamed)
                pl.BlockSpec((H, 1), lambda i: (0, 0)),    # wx (resident)
                pl.BlockSpec((H, 1), lambda i: (0, 0)),    # wy (resident)
                pl.BlockSpec(memory_space=pltpu.MemorySpace.SMEM),  # bias scalar
            ],
            out_specs=pl.BlockSpec((tm, 1), lambda i: (i, 0)),
        ),
        compiler_params=pltpu.CompilerParams(
            # Rows are fully independent -> shard the M axis across TCs (v7x).
            dimension_semantics=("parallel",)),
    )(x2, y2, wx, wy, b_arr)

    return out[:M].reshape(B, S, 1)


def _reference(x, y, weight, bias, *, alpha, use_softmax=True):
    logits = jnp.concatenate([x, y], axis=-1) @ weight.T + bias
    if use_softmax:
        s = jax.nn.softmax(logits / alpha, axis=-1)[:, :, 0:1]
    else:
        s = jax.nn.sigmoid(logits / alpha)
    return 1.0 - s  # eval-mode dropout is identity


if __name__ == "__main__":
    # small shapes consistent with the module: [batch, seq, hidden]
    B, S, H = 2, 8, 32
    alpha = 0.5

    key = jax.random.PRNGKey(0)
    kx, ky, kb, kw = jax.random.split(key, 4)
    x = jax.random.normal(kx, (B, S, H), dtype=jnp.float32)
    y = jax.random.normal(ky, (B, S, H), dtype=jnp.float32)
    bound = 1.0 / jnp.sqrt(2.0 * H)

    # Case 1: module-faithful init (weight constant -1), softmax head.
    INITIAL_STRENGTH_VALUE = -1.0
    weight_sm = jnp.full((2, 2 * H), INITIAL_STRENGTH_VALUE, dtype=jnp.float32)
    bias_sm = jax.random.uniform(kb, (2,), minval=-bound, maxval=bound,
                                 dtype=jnp.float32)
    out = jax.block_until_ready(
        strength_dial(x, y, weight_sm, bias_sm, alpha=alpha, use_softmax=True))
    ref = _reference(x, y, weight_sm, bias_sm, alpha=alpha, use_softmax=True)
    assert out.shape == (B, S, 1)
    assert jnp.allclose(out, ref, atol=1e-5, rtol=1e-5), (
        f"softmax(init) max err = {jnp.max(jnp.abs(out - ref))}")

    # Case 2: random ("trained") weights, softmax head — exercises the
    # softmax -> sigmoid(logit-difference) collapse with non-trivial matmuls.
    weight2 = 0.1 * jax.random.normal(kw, (2, 2 * H), dtype=jnp.float32)
    out2 = jax.block_until_ready(
        strength_dial(x, y, weight2, bias_sm, alpha=alpha, use_softmax=True))
    ref2 = _reference(x, y, weight2, bias_sm, alpha=alpha, use_softmax=True)
    assert jnp.allclose(out2, ref2, atol=1e-5, rtol=1e-5), (
        f"softmax(random) max err = {jnp.max(jnp.abs(out2 - ref2))}")

    # Case 3: sigmoid head (use_softmax=False, C == 1).
    weight1 = 0.1 * jax.random.normal(kw, (1, 2 * H), dtype=jnp.float32)
    bias1 = jax.random.uniform(kb, (1,), minval=-bound, maxval=bound,
                               dtype=jnp.float32)
    out1 = jax.block_until_ready(
        strength_dial(x, y, weight1, bias1, alpha=alpha, use_softmax=False))
    ref1 = _reference(x, y, weight1, bias1, alpha=alpha, use_softmax=False)
    assert jnp.allclose(out1, ref1, atol=1e-5, rtol=1e-5), (
        f"sigmoid max err = {jnp.max(jnp.abs(out1 - ref1))}")

    print("KERNEL_OK")
</pallas_src>

<mosaic_0001>
module attributes {stable_mosaic.version = 11 : i64} {
  func.func @_strength_kernel(%arg0: i32, %arg1: memref<16x32xf32, #tpu.memory_space<vmem>>, %arg2: memref<16x32xf32, #tpu.memory_space<vmem>>, %arg3: memref<32x1xf32, #tpu.memory_space<vmem>>, %arg4: memref<32x1xf32, #tpu.memory_space<vmem>>, %arg5: memref<1xf32, #tpu.memory_space<smem>>, %arg6: memref<16x1xf32, #tpu.memory_space<vmem>>) attributes {dimension_semantics = [#tpu.dimension_semantics<parallel>], iteration_bounds = array<i64: 1>, scalar_prefetch = 0 : i64, scratch_operands = 0 : i64, tpu.core_type = #tpu.core_type<tc>, window_params = [{transform_indices = @transform_0, window_bounds = array<i64: 16, 32>}, {transform_indices = @transform_1, window_bounds = array<i64: 16, 32>}, {pipeline_mode = #tpu.pipeline_mode<synchronous>, transform_indices = @transform_2, window_bounds = array<i64: 32, 1>}, {pipeline_mode = #tpu.pipeline_mode<synchronous>, transform_indices = @transform_3, window_bounds = array<i64: 32, 1>}, {transform_indices = @transform_4, window_bounds = array<i64: 1>}, {transform_indices = @transform_5, window_bounds = array<i64: 16, 1>}]} {
    %c0 = arith.constant 0 : index
    %c0_0 = arith.constant 0 : index
    %0 = vector.load %arg1[%c0, %c0_0] : memref<16x32xf32, #tpu.memory_space<vmem>>, vector<16x32xf32>
    %c0_1 = arith.constant 0 : index
    %c0_2 = arith.constant 0 : index
    %1 = vector.load %arg3[%c0_1, %c0_2] : memref<32x1xf32, #tpu.memory_space<vmem>>, vector<32x1xf32>
    %cst = arith.constant dense<0.000000e+00> : vector<16x1xf32>
    %2 = tpu.matmul %0, %1, %cst {dimension_numbers = #tpu.dot_dimension_numbers<[1], [0], [0], [1], [0, 0, 1, 1], [], []>} : vector<16x32xf32>, vector<32x1xf32>, vector<16x1xf32> -> vector<16x1xf32>
    %c0_3 = arith.constant 0 : index
    %c0_4 = arith.constant 0 : index
    %3 = vector.load %arg2[%c0_3, %c0_4] : memref<16x32xf32, #tpu.memory_space<vmem>>, vector<16x32xf32>
    %c0_5 = arith.constant 0 : index
    %c0_6 = arith.constant 0 : index
    %4 = vector.load %arg4[%c0_5, %c0_6] : memref<32x1xf32, #tpu.memory_space<vmem>>, vector<32x1xf32>
    %cst_7 = arith.constant dense<0.000000e+00> : vector<16x1xf32>
    %5 = tpu.matmul %3, %4, %cst_7 {dimension_numbers = #tpu.dot_dimension_numbers<[1], [0], [0], [1], [0, 0, 1, 1], [], []>} : vector<16x32xf32>, vector<32x1xf32>, vector<16x1xf32> -> vector<16x1xf32>
    %6 = arith.addf %2, %5 : vector<16x1xf32>
    %c0_8 = arith.constant 0 : index
    %7 = memref.load %arg5[%c0_8] : memref<1xf32, #tpu.memory_space<smem>>
    %8 = vector.broadcast %7 : f32 to vector<16x1xf32>
    %9 = arith.addf %6, %8 : vector<16x1xf32>
    %10 = math.exp %9 : vector<16x1xf32>
    %cst_9 = arith.constant 1.000000e+00 : f32
    %11 = vector.broadcast %cst_9 : f32 to vector<16x1xf32>
    %12 = arith.addf %11, %10 : vector<16x1xf32>
    %cst_10 = arith.constant 1.000000e+00 : f32
    %13 = vector.broadcast %cst_10 : f32 to vector<16x1xf32>
    %14 = arith.divf %13, %12 : vector<16x1xf32>
    %c0_11 = arith.constant 0 : index
    %c0_12 = arith.constant 0 : index
    %15 = vector.load %arg6[%c0_11, %c0_12] : memref<16x1xf32, #tpu.memory_space<vmem>>, vector<16x1xf32>
    tpu.vector_store %arg6[%c0_11, %c0_12], %14 {strides = array<i32>} : memref<16x1xf32, #tpu.memory_space<vmem>>, vector<16x1xf32>,
    return
  }
  func.func @transform_0(%arg0: i32) -> (i32, i32) {
    %c0_i32 = arith.constant 0 : i32
    %c0_i32_0 = arith.constant 0 : i32
    return %arg0, %c0_i32 : i32, i32
  }
  func.func @transform_1(%arg0: i32) -> (i32, i32) {
    %c0_i32 = arith.constant 0 : i32
    %c0_i32_0 = arith.constant 0 : i32
    return %arg0, %c0_i32 : i32, i32
  }
  func.func @transform_2(%arg0: i32) -> (i32, i32) {
    %c0_i32 = arith.constant 0 : i32
    %c0_i32_0 = arith.constant 0 : i32
    %c0_i32_1 = arith.constant 0 : i32
    return %c0_i32, %c0_i32_0 : i32, i32
  }
  func.func @transform_3(%arg0: i32) -> (i32, i32) {
    %c0_i32 = arith.constant 0 : i32
    %c0_i32_0 = arith.constant 0 : i32
    %c0_i32_1 = arith.constant 0 : i32
    return %c0_i32, %c0_i32_0 : i32, i32
  }
  func.func @transform_4(%arg0: i32) -> i32 {
    %c0_i32 = arith.constant 0 : i32
    %c0_i32_0 = arith.constant 0 : i32
    return %c0_i32 : i32
  }
  func.func @transform_5(%arg0: i32) -> (i32, i32) {
    %c0_i32 = arith.constant 0 : i32
    %c0_i32_0 = arith.constant 0 : i32
    return %arg0, %c0_i32 : i32, i32
  }
}

</mosaic_0001>

<bundles_post_ra>
// kernel: tpu_custom_call.1
= control target key start
LH: loop header
LB: loop body
LE: loop exit
PB: predicated region body
PF: predicated region fallthrough
CT: control target
= control target key end

     0   :  { %vm33_vm0 = vcmask 261120   ;;  %vm210_vm1 = vcmask 7168   ;;  %s360_s3 = inlined_call_operand.vmem [shape: f32[32,1], index: 3, kind: input, shape index: {}]   ;;  %s361_s2 = inlined_call_operand.vmem [shape: f32[32,1], index: 2, kind: input, shape index: {}]   ;;  %s362_s1 = inlined_call_operand.vmem [shape: f32[16,32], index: 1, kind: input, shape index: {}]   ;;  %s363_s0 = inlined_call_operand.vmem [shape: f32[16,32], index: 0, kind: input, shape index: {}]   ;;  %s364_s4 = inlined_call_operand.<no memory space> [shape: f32[1], index: 4, kind: input, shape index: {}]   ;;  %s365_s5 = inlined_call_operand.vmem [shape: f32[16,1], index: 5, kind: output, shape index: {}]  }
   0x1   :  { %v29_v0 = vld [vmem:[%s360_s3] sm:$0xff]  ;;  %v30_v1 = vld [vmem:[%s360_s3 + $0x8] sm:$0xff]  ;;  %v31_v5 = vld [vmem:[%s360_s3 + $0x10] sm:$0xff]  ;;  %v197_v18 = vstv %s364_s4 }
   0x2   :  { %v23_v2 = vld [vmem:[%s361_s2] sm:$0xff]  ;;  %v255_v3 = vpack.c.bf16 %v30_v1, %v29_v0  ;;  %v24_v4 = vld [vmem:[%s361_s2 + $0x8] sm:$0xff]  ;;  %v32_v6 = vld [vmem:[%s360_s3 + $0x18] sm:$0xff] }
   0x3   :  { %v263_v7 = vpack.c.bf16 %v24_v4, %v23_v2  ;;  %v259_v8 = vpack.c.bf16 %v32_v6, %v31_v5  ;;  %v25_v9 = vld [vmem:[%s361_s2 + $0x10] sm:$0xff]  ;;  %v26_v10 = vld [vmem:[%s361_s2 + $0x18] sm:$0xff]  ;;  %v27_v11 = vld [vmem:[%s362_s1] sm:$0xff] }
   0x4   :  { %256 = vmatprep.subr.bf16.mxu1 %v255_v3  ;;  %v267_v12 = vpack.c.bf16 %v26_v10, %v25_v9  ;;  %241 = vmatprep.mubr.msk.f32.mxu1 %vm33_vm0, %v27_v11  ;;  %v21_v13 = vld [vmem:[%s363_s0] sm:$0xff]  ;;  %v28_v14 = vld [vmem:[%s362_s1 + $0x8] sm:$0xff] }
   0x5   :  { %264 = vmatprep.subr.bf16.mxu0 %v263_v7  ;;  %258 = vmatpush3.bf16.msra.mxu1 %v255_v3  ;;  %v22_v15 = vld [vmem:[%s363_s0 + $0x8] sm:$0xff] }
   0x6   :  { %266 = vmatpush3.bf16.msra.mxu0 %v263_v7  ;;  %260 = vmatprep.subr.bf16.mxu1 %v259_v8 }
   0x7   :  { %268 = vmatprep.subr.bf16.mxu0 %v267_v12  ;;  %252 = vmatprep.mubr.msk.f32.mxu0 %vm33_vm0, %v21_v13 }
   0x9   :  { %262 = vmatpush3.bf16.msra.mxu1 %v259_v8 }
   0xa   :  { %270 = vmatpush3.bf16.msra.mxu0 %v267_v12 }
   0xc   :  { %242 = vmatmul.mubr.msk.f32.vlgmr.msra.gmra.mrb[0].mxu1 %vm33_vm0, %v28_v14 }
   0xd   :  { %253 = vmatmul.mubr.msk.f32.vlgmr.msra.gmra.mrb[0].mxu0 %vm33_vm0, %v22_v15 }
  0xdf   :  { %v243_v16 = vpop.f32.mrb[0].mxu1 }
  0xe0   :  { %v254_v17 = vpop.f32.mrb[0].mxu0  ;;  %v106_v19 = vpop.f32.mrb[1].mxu1 }
  0xe1   :  { %v193_v20 = vadd.f32 %v254_v17, %v243_v16  ;;  %v187_v21 = vpop.f32.mrb[1].mxu0 }
  0xe2   :  { %v188_v22 = vadd.f32 %v187_v21, %v106_v19 }
  0xe3   :  { %v199_v23 = vadd.f32 %v197_v18, %v193_v20 }
  0xe4   :  { %v198_v24 = vadd.f32 %v197_v18, %v188_v22 }
  0xe5   :  { %v202_v25 = vmul.f32 1.442695, %v199_v23 }
  0xe6   :  { %v200_v26 = vmul.f32 1.442695, %v198_v24 }
  0xe7   :  { %273 = vpow2.f32 %v202_v25 }
  0xe8   :  { %275 = vpow2.f32 %v200_v26 }
  0xf1   :  { %v274_v27 = vpop.eup %273 }
  0xf2   :  { %v276_v28 = vpop.eup %275  ;;  %v205_v29 = vadd.f32 1.0, %v274_v27 }
  0xf3   :  { %v204_v30 = vadd.f32 1.0, %v276_v28 }
  0xf4   :  { %277 = vrcp.f32 %v205_v29 }
  0xf5   :  { %279 = vrcp.f32 %v204_v30 }
  0xfe   :  { %v278_v31 = vpop.eup %277 }
  0xff   :  { %v280_v32 = vpop.eup %279  ;;  %212 = vst.msk [vmem:[%s365_s5 + $0x8] sm:$0xff] %vm210_vm1, %v278_v31 }
 0x100   :  { %211 = vst.msk [vmem:[%s365_s5] sm:$0xff] %vm210_vm1, %v280_v32 }

</bundles_post_ra>
